<compile_context>
chip_gen: v6e
topology: v6e:2x2x1
jax: 0.10.0
libtpu: 0.0.40
codegen_flags: <defaults>
</compile_context>

<pallas_src>
import math

import jax
import jax.numpy as jnp
from jax.experimental import pallas as pl
from jax.experimental.pallas import tpu as pltpu


# ----------------------------------------------------------------------------
# Architecture derivation (mirrors ReMPL.__init__ exactly)
# ----------------------------------------------------------------------------
def derive_mlp_dims(n_1, n_2, kernel_shape, reduction=1, size_thresh=128):
    total_conv_param = n_1 * n_2 * kernel_shape[0] * kernel_shape[1]
    total_conv_param = reduction * total_conv_param
    n_hiddens = 1
    while True:
        ks = kernel_shape[0] * kernel_shape[1]
        pos_sol = (1.0 / (2 * n_hiddens)) * (
            -(2 + ks) + math.sqrt((2 + ks) ** 2 + 4 * n_hiddens * total_conv_param)
        )
        hidden_size = int(pos_sol)
        if hidden_size > size_thresh:
            n_hiddens = n_hiddens + 1
        else:
            break
    return hidden_size, n_hiddens


# ----------------------------------------------------------------------------
# Deterministic parameter init (PyTorch-Linear-style uniform(-1/sqrt(fan_in), ..))
# Weights stored transposed to (fan_in, fan_out) so the kernel does `h @ W + b`.
# ----------------------------------------------------------------------------
def init_mlp_params(key, hidden_size, n_hiddens, ks_total):
    layer_dims = [(2, hidden_size)]
    for _ in range(n_hiddens):
        layer_dims.append((hidden_size, hidden_size))
    layer_dims.append((hidden_size, ks_total))

    params = []
    for fan_in, fan_out in layer_dims:
        key, kw, kb = jax.random.split(key, 3)
        bound = 1.0 / math.sqrt(fan_in)
        w = jax.random.uniform(kw, (fan_in, fan_out), jnp.float32, -bound, bound)
        b = jax.random.uniform(kb, (fan_out,), jnp.float32, -bound, bound)
        params.append((w, b))
    return params


def _round_up(x, m):
    return ((x + m - 1) // m) * m


def _cdiv(a, b):
    return -(-a // b)


# ----------------------------------------------------------------------------
# Pack params into lane-dense padded slabs.  Zero fill keeps padded lanes
# exactly zero through every ReLU / matmul, so the narrow output is exact.
#   w0b0:  (8, P_h)   f32   row0 = W0[0,:], row1 = W0[1,:], row2 = b0
#   wh:    (L, P_h, P_h)    compute dtype (bf16 by default), hidden layers
#   bh:    (L, P_h)   f32
#   wf:    (P_h, P_o)       compute dtype, final layer
#   bf:    (1, P_o)   f32
# ----------------------------------------------------------------------------
def pack_params(params, hidden_size, ks_total, compute_dtype):
    P_h = max(_round_up(hidden_size, 128), 128)
    P_o = max(_round_up(ks_total, 128), 128)

    w0, b0 = params[0]
    w0b0 = jnp.zeros((8, P_h), jnp.float32)
    w0b0 = w0b0.at[0, :hidden_size].set(w0[0])
    w0b0 = w0b0.at[1, :hidden_size].set(w0[1])
    w0b0 = w0b0.at[2, :hidden_size].set(b0)

    hidden_layers = params[1:-1]
    n_hiddens = len(hidden_layers)
    wh = jnp.zeros((n_hiddens, P_h, P_h), jnp.float32)
    bh = jnp.zeros((n_hiddens, P_h), jnp.float32)
    for l, (w, b) in enumerate(hidden_layers):
        wh = wh.at[l, :hidden_size, :hidden_size].set(w)
        bh = bh.at[l, :hidden_size].set(b)

    wfin, bfin = params[-1]
    wf = jnp.zeros((P_h, P_o), jnp.float32)
    wf = wf.at[:hidden_size, :ks_total].set(wfin)
    bf = jnp.zeros((1, P_o), jnp.float32)
    bf = bf.at[0, :ks_total].set(bfin)

    return w0b0, wh.astype(compute_dtype), bh, wf.astype(compute_dtype), bf, P_h, P_o


# ----------------------------------------------------------------------------
# Row-tile choice: amortize per-step overhead; keep >= 2 (even) blocks for
# larger M so the "parallel" grid axis can split across v7x's 2 TensorCores.
# Per-block VMEM is tiny (weights + 2 x tm x ks_total x 4B output), so tiles up
# to 1024 rows are nowhere near any generation's VMEM limits.
# ----------------------------------------------------------------------------
def choose_row_tile(M):
    M8 = _round_up(M, 8)
    if M8 <= 256:
        return M8                      # single block; step overhead dominates
    num_blocks = 2 * _cdiv(M8, 2048)   # even count, ~<=1024-row tiles
    return _round_up(_cdiv(M8, num_blocks), 8)


# ----------------------------------------------------------------------------
# Pallas kernel: coordinates generated in-kernel, first layer (K=2) on the VPU,
# hidden + final layers as lane-dense MXU matmuls (bf16 in, f32 accumulate),
# narrow (tm, ks_total) output block (no padded-slab HBM writeback).
# ----------------------------------------------------------------------------
def make_mlp_kernel(n_hiddens, n_1, n_2, tm, ks_total, compute_dtype):
    step_x = 2.0 / (n_1 - 1) if n_1 > 1 else 0.0
    step_y = 2.0 / (n_2 - 1) if n_2 > 1 else 0.0
    # Strength-reduce // and % to shift/and when n_2 is a power of two.
    n2_shift = (n_2.bit_length() - 1) if (n_2 & (n_2 - 1)) == 0 else None

    def kernel(w0b0_ref, wh_ref, bh_ref, wf_ref, bf_ref, out_ref):
        # Row indices of this tile -> (x, y) coordinates of the linspace grid.
        row = jax.lax.broadcasted_iota(jnp.int32, (tm, 1), 0)
        m = pl.program_id(0) * tm + row                       # (tm, 1)
        if n2_shift is not None:
            xi = (m >> n2_shift).astype(jnp.float32)
            yi = (m & (n_2 - 1)).astype(jnp.float32)
        else:
            xi = (m // n_2).astype(jnp.float32)
            yi = (m % n_2).astype(jnp.float32)
        x = -1.0 + step_x * xi                                # (tm, 1)
        y = -1.0 + step_y * yi                                # (tm, 1)

        # First layer (fan_in = 2) on the VPU in f32: two broadcast FMAs + bias.
        h = x * w0b0_ref[0:1, :] + y * w0b0_ref[1:2, :] + w0b0_ref[2:3, :]
        h = jnp.maximum(h, 0.0)                               # (tm, P_h) f32

        def hidden(h_f32, w, b):
            acc = jnp.dot(h_f32.astype(compute_dtype), w,
                          preferred_element_type=jnp.float32) + b
            return jnp.maximum(acc, 0.0)

        if n_hiddens <= 8:
            # Unrolled: best LLO scheduling at small depth.
            for l in range(n_hiddens):
                h = hidden(h, wh_ref[l], bh_ref[l:l + 1, :])
        else:
            # Deep MLP: rolled loop with dynamic layer indexing.
            def body(l, h_f32):
                return hidden(h_f32, wh_ref[l], bh_ref[pl.ds(l, 1), :])
            h = jax.lax.fori_loop(0, n_hiddens, body, h)

        # Final layer (no ReLU); store only the real ks_total lanes.
        o = jnp.dot(h.astype(compute_dtype), wf_ref[...],
                    preferred_element_type=jnp.float32) + bf_ref[...]
        out_ref[...] = o[:, :ks_total]

    return kernel


# ----------------------------------------------------------------------------
# Forward (equivalent to ReMPL.forward).  `x_nchw` accepted but unused, matching
# the PyTorch module which only uses input.device.
# ----------------------------------------------------------------------------
def rempl_forward(x_nchw, params, n_1, n_2, kernel_shape, hidden_size,
                  use_bf16=True):
    del x_nchw  # only used for .device in the PyTorch module
    kh, kw = kernel_shape
    ks_total = kh * kw
    compute_dtype = jnp.bfloat16 if use_bf16 else jnp.float32

    w0b0, wh, bh, wf, bf, P_h, P_o = pack_params(
        params, hidden_size, ks_total, compute_dtype)
    n_hiddens = wh.shape[0]

    M = n_1 * n_2
    tm = choose_row_tile(M)
    num_blocks = _cdiv(M, tm)
    m_pad = num_blocks * tm

    kernel = make_mlp_kernel(n_hiddens, n_1, n_2, tm, ks_total, compute_dtype)

    # VMEM budget from actual usage (inputs double-buffered by BlockSpec) plus
    # headroom; always far below v7x's 64 MiB physical / 32 MiB scoped default.
    in_bytes = int(w0b0.nbytes + wh.nbytes + bh.nbytes + wf.nbytes + bf.nbytes)
    out_block_bytes = tm * ks_total * 4
    scratch_bytes = 4 * tm * P_h * 4  # h (f32) + bf16 copies + slack
    vmem_limit = int(min(64 << 20,
                         max(8 << 20,
                             2 * in_bytes + 2 * out_block_bytes
                             + scratch_bytes + (2 << 20))))

    flops = (4 * M * P_h                        # first layer (VPU FMAs)
             + 2 * M * P_h * P_h * n_hiddens    # hidden matmuls
             + 2 * M * P_h * P_o)               # final matmul
    cost = pl.CostEstimate(flops=flops, transcendentals=0,
                           bytes_accessed=in_bytes + M * ks_total * 4)

    out = pl.pallas_call(
        kernel,
        out_shape=jax.ShapeDtypeStruct((m_pad, ks_total), jnp.float32),
        grid_spec=pltpu.PrefetchScalarGridSpec(
            num_scalar_prefetch=0,
            grid=(num_blocks,),
            in_specs=[
                pl.BlockSpec((8, P_h), lambda i: (0, 0)),              # w0b0, resident
                pl.BlockSpec((n_hiddens, P_h, P_h), lambda i: (0, 0, 0)),  # wh, resident
                pl.BlockSpec((n_hiddens, P_h), lambda i: (0, 0)),      # bh, resident
                pl.BlockSpec((P_h, P_o), lambda i: (0, 0)),            # wf, resident
                pl.BlockSpec((1, P_o), lambda i: (0, 0)),              # bf, resident
            ],
            out_specs=pl.BlockSpec((tm, ks_total), lambda i: (i, 0)),
        ),
        compiler_params=pltpu.CompilerParams(
            dimension_semantics=("parallel",),
            vmem_limit_bytes=vmem_limit,
        ),
        cost_estimate=cost,
    )(w0b0, wh, bh, wf, bf)

    # Rows >= M were computed from out-of-range coordinates; discard them.
    return out[:M].reshape(n_1, n_2, kh, kw)


# ----------------------------------------------------------------------------
# Pure-JAX reference for sanity checking
# ----------------------------------------------------------------------------
def rempl_reference(params, n_1, n_2, kernel_shape):
    kh, kw = kernel_shape
    xs = jnp.linspace(-1.0, 1.0, n_1)
    ys = jnp.linspace(-1.0, 1.0, n_2)
    xx, yy = jnp.meshgrid(xs, ys, indexing="ij")
    h = jnp.stack([xx.reshape(-1), yy.reshape(-1)], axis=1).astype(jnp.float32)
    n_layers = len(params)
    for i, (w, b) in enumerate(params):
        h = h @ w + b[None, :]
        if i < n_layers - 1:
            h = jnp.maximum(h, 0.0)
    return h.reshape(n_1, n_2, kh, kw)


if __name__ == "__main__":
    def run_case(key, n_1, n_2, kernel_shape, x_shape):
        ks_total = kernel_shape[0] * kernel_shape[1]
        hidden_size, n_hiddens = derive_mlp_dims(n_1, n_2, kernel_shape)
        k_params, k_x = jax.random.split(key)
        params = init_mlp_params(k_params, hidden_size, n_hiddens, ks_total)
        x = jax.random.normal(k_x, x_shape, jnp.float32)  # ignored by forward
        ref = rempl_reference(params, n_1, n_2, kernel_shape)

        # f32 MXU path: tight check against the pure-JAX reference.
        out32 = jax.block_until_ready(
            rempl_forward(x, params, n_1, n_2, kernel_shape, hidden_size,
                          use_bf16=False))
        assert out32.shape == (n_1, n_2, kernel_shape[0], kernel_shape[1])
        assert jnp.allclose(out32, ref, atol=1e-4, rtol=1e-4)

        # bf16 MXU path (default / fast): looser numerics.
        out16 = jax.block_until_ready(
            rempl_forward(x, params, n_1, n_2, kernel_shape, hidden_size,
                          use_bf16=True))
        assert out16.shape == (n_1, n_2, kernel_shape[0], kernel_shape[1])
        assert jnp.allclose(out16, ref, atol=5e-2, rtol=5e-2)

    key = jax.random.PRNGKey(0)
    k1, k2 = jax.random.split(key)

    # Small case: Conv2d(in=4, out=8, k=3) -> hidden=12, n_hiddens=1, 1 block,
    # power-of-two n_2 (shift/and coordinate path).
    run_case(k1, 8, 4, (3, 3), (2, 4, 16, 16))

    # Larger case: Conv2d(in=24, out=40, k=3) -> exercises the multi-block grid
    # (2 row tiles, v7x dual-TC split) and the non-pow2 n_2 div/mod path.
    run_case(k2, 40, 24, (3, 3), (2, 24, 8, 8))

    print("KERNEL_OK")
</pallas_src>

<mosaic_0001>
module attributes {stable_mosaic.version = 11 : i64} {
  func.func @kernel(%arg0: i32, %arg1: memref<8x128xf32, #tpu.memory_space<vmem>>, %arg2: memref<1x128x128xf32, #tpu.memory_space<vmem>>, %arg3: memref<1x128xf32, #tpu.memory_space<vmem>>, %arg4: memref<128x128xf32, #tpu.memory_space<vmem>>, %arg5: memref<1x128xf32, #tpu.memory_space<vmem>>, %arg6: memref<32x9xf32, #tpu.memory_space<vmem>>) attributes {dimension_semantics = [#tpu.dimension_semantics<parallel>], iteration_bounds = array<i64: 1>, scalar_prefetch = 0 : i64, scratch_operands = 0 : i64, tpu.core_type = #tpu.core_type<tc>, window_params = [{pipeline_mode = #tpu.pipeline_mode<synchronous>, transform_indices = @transform_0, window_bounds = array<i64: 8, 128>}, {pipeline_mode = #tpu.pipeline_mode<synchronous>, transform_indices = @transform_1, window_bounds = array<i64: 1, 128, 128>}, {pipeline_mode = #tpu.pipeline_mode<synchronous>, transform_indices = @transform_2, window_bounds = array<i64: 1, 128>}, {pipeline_mode = #tpu.pipeline_mode<synchronous>, transform_indices = @transform_3, window_bounds = array<i64: 128, 128>}, {pipeline_mode = #tpu.pipeline_mode<synchronous>, transform_indices = @transform_4, window_bounds = array<i64: 1, 128>}, {transform_indices = @transform_5, window_bounds = array<i64: 32, 9>}]} {
    %0 = tpu.iota {dimensions = array<i32: 0>} : vector<32x1xi32>
    %c32_i32 = arith.constant 32 : i32
    %1 = arith.muli %arg0, %c32_i32 : i32
    %2 = vector.broadcast %1 : i32 to vector<32x1xi32>
    %3 = arith.addi %2, %0 : vector<32x1xi32>
    %c2_i32 = arith.constant 2 : i32
    %4 = vector.broadcast %c2_i32 : i32 to vector<32x1xi32>
    %5 = arith.shrsi %3, %4 : vector<32x1xi32>
    %6 = arith.sitofp %5 : vector<32x1xi32> to vector<32x1xf32>
    %c3_i32 = arith.constant 3 : i32
    %7 = vector.broadcast %c3_i32 : i32 to vector<32x1xi32>
    %8 = arith.andi %3, %7 : vector<32x1xi32>
    %9 = arith.sitofp %8 : vector<32x1xi32> to vector<32x1xf32>
    %cst = arith.constant 0.285714298 : f32
    %10 = vector.broadcast %cst : f32 to vector<32x1xf32>
    %11 = arith.mulf %10, %6 : vector<32x1xf32>
    %cst_0 = arith.constant -1.000000e+00 : f32
    %12 = vector.broadcast %cst_0 : f32 to vector<32x1xf32>
    %13 = arith.addf %12, %11 : vector<32x1xf32>
    %cst_1 = arith.constant 0.666666686 : f32
    %14 = vector.broadcast %cst_1 : f32 to vector<32x1xf32>
    %15 = arith.mulf %14, %9 : vector<32x1xf32>
    %cst_2 = arith.constant -1.000000e+00 : f32
    %16 = vector.broadcast %cst_2 : f32 to vector<32x1xf32>
    %17 = arith.addf %16, %15 : vector<32x1xf32>
    %c0 = arith.constant 0 : index
    %c0_3 = arith.constant 0 : index
    %18 = vector.load %arg1[%c0, %c0_3] : memref<8x128xf32, #tpu.memory_space<vmem>>, vector<1x128xf32>
    %19 = vector.broadcast %13 : vector<32x1xf32> to vector<32x128xf32>
    %20 = vector.broadcast %18 : vector<1x128xf32> to vector<32x128xf32>
    %21 = arith.mulf %19, %20 : vector<32x128xf32>
    %c1 = arith.constant 1 : index
    %c0_4 = arith.constant 0 : index
    %22 = vector.load %arg1[%c1, %c0_4] : memref<8x128xf32, #tpu.memory_space<vmem>>, vector<1x128xf32>
    %23 = vector.broadcast %17 : vector<32x1xf32> to vector<32x128xf32>
    %24 = vector.broadcast %22 : vector<1x128xf32> to vector<32x128xf32>
    %25 = arith.mulf %23, %24 : vector<32x128xf32>
    %26 = arith.addf %21, %25 : vector<32x128xf32>
    %c2 = arith.constant 2 : index
    %c0_5 = arith.constant 0 : index
    %27 = vector.load %arg1[%c2, %c0_5] : memref<8x128xf32, #tpu.memory_space<vmem>>, vector<1x128xf32>
    %28 = vector.broadcast %27 : vector<1x128xf32> to vector<32x128xf32>
    %29 = arith.addf %26, %28 : vector<32x128xf32>
    %cst_6 = arith.constant 0.000000e+00 : f32
    %30 = vector.broadcast %cst_6 : f32 to vector<32x128xf32>
    %31 = arith.maximumf %29, %30 : vector<32x128xf32>
    %c0_7 = arith.constant 0 : index
    %c0_8 = arith.constant 0 : index
    %c0_9 = arith.constant 0 : index
    %32 = vector.load %arg2[%c0_7, %c0_8, %c0_9] : memref<1x128x128xf32, #tpu.memory_space<vmem>>, vector<1x128x128xf32>
    %33 = vector.shape_cast %32 : vector<1x128x128xf32> to vector<128x128xf32>
    %c0_10 = arith.constant 0 : index
    %c0_11 = arith.constant 0 : index
    %34 = vector.load %arg3[%c0_10, %c0_11] : memref<1x128xf32, #tpu.memory_space<vmem>>, vector<1x128xf32>
    %cst_12 = arith.constant dense<0.000000e+00> : vector<32x128xf32>
    %35 = tpu.matmul %31, %33, %cst_12 {dimension_numbers = #tpu.dot_dimension_numbers<[1], [0], [0], [1], [0, 0, 1, 1], [], []>} : vector<32x128xf32>, vector<128x128xf32>, vector<32x128xf32> -> vector<32x128xf32>
    %36 = vector.broadcast %34 : vector<1x128xf32> to vector<32x128xf32>
    %37 = arith.addf %35, %36 : vector<32x128xf32>
    %cst_13 = arith.constant 0.000000e+00 : f32
    %38 = vector.broadcast %cst_13 : f32 to vector<32x128xf32>
    %39 = arith.maximumf %37, %38 : vector<32x128xf32>
    %c0_14 = arith.constant 0 : index
    %c0_15 = arith.constant 0 : index
    %40 = vector.load %arg4[%c0_14, %c0_15] : memref<128x128xf32, #tpu.memory_space<vmem>>, vector<128x128xf32>
    %cst_16 = arith.constant dense<0.000000e+00> : vector<32x128xf32>
    %41 = tpu.matmul %39, %40, %cst_16 {dimension_numbers = #tpu.dot_dimension_numbers<[1], [0], [0], [1], [0, 0, 1, 1], [], []>} : vector<32x128xf32>, vector<128x128xf32>, vector<32x128xf32> -> vector<32x128xf32>
    %c0_17 = arith.constant 0 : index
    %c0_18 = arith.constant 0 : index
    %42 = vector.load %arg5[%c0_17, %c0_18] : memref<1x128xf32, #tpu.memory_space<vmem>>, vector<1x128xf32>
    %43 = vector.broadcast %42 : vector<1x128xf32> to vector<32x128xf32>
    %44 = arith.addf %41, %43 : vector<32x128xf32>
    %45 = vector.extract_strided_slice %44 {offsets = [0, 0], sizes = [32, 9], strides = [1, 1]} : vector<32x128xf32> to vector<32x9xf32>
    %c0_19 = arith.constant 0 : index
    %c0_20 = arith.constant 0 : index
    %46 = vector.load %arg6[%c0_19, %c0_20] : memref<32x9xf32, #tpu.memory_space<vmem>>, vector<32x9xf32>
    tpu.vector_store %arg6[%c0_19, %c0_20], %45 {strides = array<i32>} : memref<32x9xf32, #tpu.memory_space<vmem>>, vector<32x9xf32>,
    return
  }
  func.func @transform_0(%arg0: i32) -> (i32, i32) {
    %c0_i32 = arith.constant 0 : i32
    %c0_i32_0 = arith.constant 0 : i32
    %c0_i32_1 = arith.constant 0 : i32
    return %c0_i32, %c0_i32_0 : i32, i32
  }
  func.func @transform_1(%arg0: i32) -> (i32, i32, i32) {
    %c0_i32 = arith.constant 0 : i32
    %c0_i32_0 = arith.constant 0 : i32
    %c0_i32_1 = arith.constant 0 : i32
    %c0_i32_2 = arith.constant 0 : i32
    return %c0_i32, %c0_i32_0, %c0_i32_1 : i32, i32, i32
  }
  func.func @transform_2(%arg0: i32) -> (i32, i32) {
    %c0_i32 = arith.constant 0 : i32
    %c0_i32_0 = arith.constant 0 : i32
    %c0_i32_1 = arith.constant 0 : i32
    return %c0_i32, %c0_i32_0 : i32, i32
  }
  func.func @transform_3(%arg0: i32) -> (i32, i32) {
    %c0_i32 = arith.constant 0 : i32
    %c0_i32_0 = arith.constant 0 : i32
    %c0_i32_1 = arith.constant 0 : i32
    return %c0_i32, %c0_i32_0 : i32, i32
  }
  func.func @transform_4(%arg0: i32) -> (i32, i32) {
    %c0_i32 = arith.constant 0 : i32
    %c0_i32_0 = arith.constant 0 : i32
    %c0_i32_1 = arith.constant 0 : i32
    return %c0_i32, %c0_i32_0 : i32, i32
  }
  func.func @transform_5(%arg0: i32) -> (i32, i32) {
    %c0_i32 = arith.constant 0 : i32
    %c0_i32_0 = arith.constant 0 : i32
    return %arg0, %c0_i32 : i32, i32
  }
}

</mosaic_0001>

<bundles_post_ra>
// kernel: tpu_custom_call.1
= control target key start
LH: loop header
LB: loop body
LE: loop exit
PB: predicated region body
PF: predicated region fallthrough
CT: control target
= control target key end

     0   :  { %10 = vsyncpa [#allocation3], 0  ;;  %s638_s0 = inlined_call_operand.hbm [shape: f32[8,128], index: 0, kind: input, shape index: {}]   ;;  %s639_s1 = inlined_call_operand.hbm [shape: f32[1,128,128], index: 1, kind: input, shape index: {}]   ;;  %s640_s2 = inlined_call_operand.vmem [shape: f32[1,128], index: 2, kind: input, shape index: {}]   ;;  %s641_s3 = inlined_call_operand.hbm [shape: f32[128,128], index: 3, kind: input, shape index: {}]   ;;  %s642_s4 = inlined_call_operand.vmem [shape: f32[1,128], index: 4, kind: input, shape index: {}]   ;;  %s643_s5 = inlined_call_operand.vmem [shape: f32[32,9], index: 5, kind: output, shape index: {}]  }
   0x1   :  { %11 = vsyncpa [#allocation5], 0  ;;  %s558_s18 = smov [#allocation4]  }
   0x2   :  { %s27_s19 = sshll.u32 %s558_s18, 4  ;;  %s28_s19 = int_to_ptr.vmem [resolvable:$true] %s27_s19 }
   0x3   :  { %s502_s20 = scalar_lea.vmem %s28_s19, 2048  ;;  %p507_p1 = scmp.lt.s32.totalorder %s28_s19, %s28_s19 }
   0x4   :  { %p503_p0 = scmp.ne.s32.totalorder %s28_s19, %s502_s20  ;;  %p508_p2 = scmp.lt.s32.totalorder %s502_s20, %s502_s20 }
   0x6   :  { %p509_p3 = por %p508_p2, %p507_p1 }
   0x8   :  { %p510_p4 = pnand %p509_p3, %p503_p0 }
   0xa   :  { %513 = shalt.err (!%p510_p4)
}
   0xb   :  { %s559_s21 = smov 128   ;;  %s560_s22 = smov 8  }
   0xc   :  { %33 = dma.hbm_to_vmem [thread:$0]  %s639_s1, 2048, %s28_s19, [#allocation5], %s559_s21, %s559_s21, %s560_s22  }
   0xd   :  { %s561_s25 = smov [#allocation2]   ;;  %s562_s27 = smov [#allocation6]  }
   0xe   :  { %s18_s26 = sshll.u32 %s561_s25, 4  ;;  %s41_s28 = sshll.u32 %s562_s27, 4  ;;  %s19_s26 = int_to_ptr.vmem [resolvable:$true] %s18_s26  ;;  %s42_s28 = int_to_ptr.vmem [resolvable:$true] %s41_s28 }
   0xf   :  { %s522_s29 = scalar_lea.vmem %s19_s26, 128  ;;  %p527_p6 = scmp.lt.s32.totalorder %s19_s26, %s19_s26 }
  0x10   :  { %p523_p5 = scmp.ne.s32.totalorder %s19_s26, %s522_s29  ;;  %p528_p7 = scmp.lt.s32.totalorder %s522_s29, %s522_s29 }
  0x12   :  { %p529_p8 = por %p528_p7, %p527_p6 }
  0x14   :  { %p530_p9 = pnand %p529_p8, %p523_p5 }
  0x16   :  { %533 = shalt.err (!%p530_p9)
}
  0x17   :  { %21 = dma.hbm_to_vmem [thread:$0]  %s638_s0, 128, %s19_s26, [#allocation3]  }
  0x18   :  { %s542_s7 = scalar_lea.vmem %s42_s28, 2048  ;;  %p547_p11 = scmp.lt.s32.totalorder %s42_s28, %s42_s28 }
  0x19   :  { %p543_p10 = scmp.ne.s32.totalorder %s42_s28, %s542_s7  ;;  %p548_p12 = scmp.lt.s32.totalorder %s542_s7, %s542_s7 }
  0x1b   :  { %p549_p13 = por %p548_p12, %p547_p11 }
  0x1d   :  { %p550_p0 = pnand %p549_p13, %p543_p10 }
  0x1f   :  { %553 = shalt.err (!%p550_p0)
}
  0x20   :  { %47 = dma.hbm_to_vmem [thread:$0]  %s641_s3, 2048, %s42_s28, [#allocation5], %s559_s21, %s559_s21, %s560_s22  }
  0x21   :  { %554 = dma.done.wait [#allocation3], 128  }
  0x22   :  { %555 = vsyncadd [#allocation3], 4294967168 }
  0x23   :  { %556 = dma.done.wait [#allocation5], 4096  }
  0x24   :  { %557 = vsyncadd [#allocation5], 4294963200  ;;  %v59_v0 = vlaneseq  ;;  %v152_v8 = vld [vmem:[#allocation4 + $0x78] sm:$0xff]  ;;  %v151_v9 = vld [vmem:[#allocation4 + $0x70] sm:$0xff]  ;;  %vm357_vm0 = vcmask 72704  }
  0x25   :  { %413 = vmatprep.subr.mxu0 %v152_v8  ;;  %v150_v14 = vld [vmem:[#allocation4 + $0x68] sm:$0xff]  ;;  %v149_v19 = vld [vmem:[#allocation4 + $0x60] sm:$0xff]  ;;  %v602_v22 = vld [vmem:[#allocation2] ss:$0 sm:$0xff] }
  0x26   :  { %v60_v1 = vshrl.u32 %v59_v0, 7  ;;  %414 = vmatpush3.msra.mxu0 %v152_v8  ;;  %v604_v23 = vld [vmem:[#allocation2 + $0x1] ss:$0 sm:$0xff]  ;;  %v608_v33 = vld [vmem:[#allocation2 + $0x2] ss:$0 sm:$0xff]  ;;  %v147_v34 = vld [vmem:[#allocation4 + $0x50] sm:$0xff] }
  0x27   :  { %415 = vmatprep.subr.mxu0 %v151_v9  ;;  %v148_v27 = vld [vmem:[#allocation4 + $0x58] sm:$0xff]  ;;  %v263_v37 = vld [vmem:[#allocation6 + $0x70] sm:$0xff]  ;;  %v262_v38 = vld [vmem:[#allocation6 + $0x68] sm:$0xff] }
  0x28   :  { %v70_v2 = vshra.s32 %v60_v1, 2  ;;  %v78_v3 = vand.u32 3, %v60_v1  ;;  %v61_v4 = vadd.s32 8, %v60_v1  ;;  %v62_v5 = vadd.s32 16, %v60_v1  ;;  %416 = vmatpush3.msra.mxu0 %v151_v9  ;;  %v264_v32 = vld [vmem:[#allocation6 + $0x78] sm:$0xff]  ;;  %v146_v42 = vld [vmem:[#allocation4 + $0x48] sm:$0xff] }
  0x29   :  { %v63_v13 = vadd.s32 24, %v60_v1  ;;  %417 = vmatprep.subr.mxu0 %v150_v14  ;;  %451 = vmatprep.subr.mxu1 %v264_v32  ;;  %v261_v46 = vld [vmem:[#allocation6 + $0x60] sm:$0xff]  ;;  %v260_v53 = vld [vmem:[#allocation6 + $0x58] sm:$0xff]  ;;  %v259_v57 = vld [vmem:[#allocation6 + $0x50] sm:$0xff] }
  0x2a   :  { %v74_v6 = vcvt.s32.f32 %v70_v2  ;;  %v82_v7 = vcvt.s32.f32 %v78_v3  ;;  %v71_v10 = vshra.s32 %v61_v4, 2  ;;  %v79_v12 = vand.u32 3, %v61_v4  ;;  %418 = vmatpush3.msra.mxu0 %v150_v14  ;;  %452 = vmatpush3.msra.mxu1 %v264_v32  ;;  %v145_v47 = vld [vmem:[#allocation4 + $0x40] sm:$0xff]  ;;  %v144_v54 = vld [vmem:[#allocation4 + $0x38] sm:$0xff]  ;;  %v143_v58 = vld [vmem:[#allocation4 + $0x30] sm:$0xff] }
  0x2b   :  { %v72_v16 = vshra.s32 %v62_v5, 2  ;;  %v80_v17 = vand.u32 3, %v62_v5  ;;  %v73_v25 = vshra.s32 %v63_v13, 2  ;;  %v81_v26 = vand.u32 3, %v63_v13  ;;  %419 = vmatprep.subr.mxu0 %v149_v19  ;;  %453 = vmatprep.subr.mxu1 %v263_v37  ;;  %v258_v63 = vld [vmem:[#allocation6 + $0x48] sm:$0xff]  ;;  %v257_v3 = vld [vmem:[#allocation6 + $0x40] sm:$0xff] }
  0x2c   :  { %v86_v11 = vmul.f32 0.2857143, %v74_v6  ;;  %v94_v15 = vmul.f32 0.6666667, %v82_v7  ;;  %v75_v21 = vcvt.s32.f32 %v71_v10  ;;  %v83_v24 = vcvt.s32.f32 %v79_v12  ;;  %420 = vmatpush3.msra.mxu0 %v149_v19  ;;  %454 = vmatpush3.msra.mxu1 %v263_v37  ;;  %v142_v0 = vld [vmem:[#allocation4 + $0x28] sm:$0xff]  ;;  %v141_v4 = vld [vmem:[#allocation4 + $0x20] sm:$0xff] }
  0x2d   :  { %v76_v30 = vcvt.s32.f32 %v72_v16  ;;  %v84_v31 = vcvt.s32.f32 %v80_v17  ;;  %421 = vmatprep.subr.mxu0 %v148_v27  ;;  %v77_v40 = vcvt.s32.f32 %v73_v25  ;;  %v85_v41 = vcvt.s32.f32 %v81_v26  ;;  %455 = vmatprep.subr.mxu1 %v262_v38  ;;  %v256_v8 = vld [vmem:[#allocation6 + $0x38] sm:$0xff]  ;;  %v139_v12 = vld [vmem:[#allocation4 + $0x10] sm:$0xff]  ;;  %v138_v16 = vld [vmem:[#allocation4 + $0x8] sm:$0xff] }
  0x2e   :  { %v90_v18 = vadd.f32 -1.0, %v86_v11  ;;  %v98_v20 = vadd.f32 -1.0, %v94_v15  ;;  %v87_v36 = vmul.f32 0.2857143, %v75_v21  ;;  %v95_v39 = vmul.f32 0.6666667, %v83_v24  ;;  %422 = vmatpush3.msra.mxu0 %v148_v27  ;;  %456 = vmatpush3.msra.mxu1 %v262_v38 }
  0x2f   :  { %v88_v44 = vmul.f32 0.2857143, %v76_v30  ;;  %v96_v45 = vmul.f32 0.6666667, %v84_v31  ;;  %423 = vmatprep.subr.mxu0 %v147_v34  ;;  %v89_v51 = vmul.f32 0.2857143, %v77_v40  ;;  %457 = vmatprep.subr.mxu1 %v261_v46 }
  0x30   :  { %v107_v28 = vmul.f32 %v602_v22, %v90_v18  ;;  %v116_v29 = vmul.f32 %v604_v23, %v98_v20  ;;  %424 = vmatpush3.msra.mxu0 %v147_v34  ;;  %v91_v49 = vadd.f32 -1.0, %v87_v36  ;;  %v99_v50 = vadd.f32 -1.0, %v95_v39  ;;  %458 = vmatpush3.msra.mxu1 %v261_v46  ;;  %v140_v9 = vld [vmem:[#allocation4 + $0x18] sm:$0xff]  ;;  %v255_v11 = vld [vmem:[#allocation6 + $0x30] sm:$0xff]  ;;  %v254_v15 = vld [vmem:[#allocation6 + $0x28] sm:$0xff] }
  0x31   :  { %425 = vmatprep.subr.mxu0 %v146_v42  ;;  %v97_v52 = vmul.f32 0.6666667, %v85_v41  ;;  %v92_v55 = vadd.f32 -1.0, %v88_v44  ;;  %v100_v56 = vadd.f32 -1.0, %v96_v45  ;;  %459 = vmatprep.subr.mxu1 %v260_v53  ;;  %v93_v61 = vadd.f32 -1.0, %v89_v51  ;;  %v253_v18 = vld [vmem:[#allocation6 + $0x20] sm:$0xff] }
  0x32   :  { %v120_v35 = vadd.f32 %v116_v29, %v107_v28  ;;  %426 = vmatpush3.msra.mxu0 %v146_v42  ;;  %v108_v59 = vmul.f32 %v602_v22, %v91_v49  ;;  %v117_v60 = vmul.f32 %v604_v23, %v99_v50  ;;  %460 = vmatpush3.msra.mxu1 %v260_v53  ;;  %v137_v19 = vld [vmem:[#allocation4] sm:$0xff]  ;;  %v252_v24 = vld [vmem:[#allocation6 + $0x18] sm:$0xff]  ;;  %v251_v25 = vld [vmem:[#allocation6 + $0x10] sm:$0xff] }
  0x33   :  { %427 = vmatprep.subr.mxu0 %v145_v47  ;;  %v101_v62 = vadd.f32 -1.0, %v97_v52  ;;  %v109_v1 = vmul.f32 %v602_v22, %v92_v55  ;;  %v118_v2 = vmul.f32 %v604_v23, %v100_v56  ;;  %461 = vmatprep.subr.mxu1 %v259_v57  ;;  %v110_v6 = vmul.f32 %v602_v22, %v93_v61  ;;  %v250_v26 = vld [vmem:[#allocation6 + $0x8] sm:$0xff]  ;;  %v249_v27 = vld [vmem:[#allocation6] sm:$0xff]  ;;  %v371_v28 = vld [vmem:[%s640_s2] ss:$0 sm:$0xff] }
  0x34   :  { %v129_v43 = vadd.f32 %v608_v33, %v120_v35  ;;  %428 = vmatpush3.msra.mxu0 %v145_v47  ;;  %462 = vmatpush3.msra.mxu1 %v259_v57  ;;  %v121_v5 = vadd.f32 %v117_v60, %v108_v59  ;;  %v372_v41 = vld [vmem:[%s642_s4] ss:$0 sm:$0xff] }
  0x35   :  { %429 = vmatprep.subr.mxu0 %v144_v54  ;;  %463 = vmatprep.subr.mxu1 %v258_v63  ;;  %v119_v7 = vmul.f32 %v604_v23, %v101_v62  ;;  %v122_v10 = vadd.f32 %v118_v2, %v109_v1 }
  0x36   :  { %v133_v48 = vmax.f32 %v129_v43, 0.0  ;;  %430 = vmatpush3.msra.mxu0 %v144_v54  ;;  %464 = vmatpush3.msra.mxu1 %v258_v63  ;;  %v130_v13 = vadd.f32 %v608_v33, %v121_v5 }
  0x37   :  { %431 = vmatprep.subr.mxu0 %v143_v58  ;;  %465 = vmatprep.subr.mxu1 %v257_v3  ;;  %v123_v14 = vadd.f32 %v119_v7, %v110_v6  ;;  %v131_v17 = vadd.f32 %v608_v33, %v122_v10 }
  0x38   :  { %445 = vmatprep.mubr.f32.mxu0 %v133_v48  ;;  %432 = vmatpush3.msra.mxu0 %v143_v58  ;;  %v134_v20 = vmax.f32 %v130_v13, 0.0 }
  0x39   :  { %433 = vmatprep.subr.mxu0 %v142_v0  ;;  %466 = vmatpush3.msra.mxu1 %v257_v3  ;;  %v132_v21 = vadd.f32 %v608_v33, %v123_v14  ;;  %v135_v22 = vmax.f32 %v131_v17, 0.0 }
  0x3a   :  { %434 = vmatpush3.msra.mxu0 %v142_v0  ;;  %467 = vmatprep.subr.mxu1 %v256_v8 }
  0x3b   :  { %435 = vmatprep.subr.mxu0 %v141_v4  ;;  %468 = vmatpush3.msra.mxu1 %v256_v8  ;;  %v136_v23 = vmax.f32 %v132_v21, 0.0 }
  0x3c   :  { %436 = vmatpush3.msra.mxu0 %v141_v4  ;;  %469 = vmatprep.subr.mxu1 %v255_v11 }
  0x3d   :  { %437 = vmatprep.subr.mxu0 %v140_v9  ;;  %470 = vmatpush3.msra.mxu1 %v255_v11 }
  0x3e   :  { %438 = vmatpush3.msra.mxu0 %v140_v9  ;;  %471 = vmatprep.subr.mxu1 %v254_v15 }
  0x3f   :  { %439 = vmatprep.subr.mxu0 %v139_v12  ;;  %472 = vmatpush3.msra.mxu1 %v254_v15 }
  0x40   :  { %440 = vmatpush3.msra.mxu0 %v139_v12  ;;  %473 = vmatprep.subr.mxu1 %v253_v18 }
  0x41   :  { %441 = vmatprep.subr.mxu0 %v138_v16  ;;  %474 = vmatpush3.msra.mxu1 %v253_v18 }
  0x42   :  { %442 = vmatpush3.msra.mxu0 %v138_v16  ;;  %475 = vmatprep.subr.mxu1 %v252_v24 }
  0x43   :  { %443 = vmatprep.subr.mxu0 %v137_v19  ;;  %476 = vmatpush3.msra.mxu1 %v252_v24 }
  0x44   :  { %444 = vmatpush3.msra.mxu0 %v137_v19  ;;  %477 = vmatprep.subr.mxu1 %v251_v25 }
  0x45   :  { %446 = vmatmul.mubr.f32.vlgmr.msra.gmra.mxu0 %v134_v20  ;;  %478 = vmatpush3.msra.mxu1 %v251_v25 }
  0x46   :  { %448 = vmatprep.mubr.f32.mxu0 %v135_v22  ;;  %479 = vmatprep.subr.mxu1 %v250_v26 }
  0x47   :  { %480 = vmatpush3.msra.mxu1 %v250_v26 }
  0x48   :  { %481 = vmatprep.subr.mxu1 %v249_v27 }
  0x49   :  { %449 = vmatmul.mubr.f32.gmra.mxu0 %v136_v23  ;;  %482 = vmatpush3.msra.mxu1 %v249_v27 }
 0x105   :  { %v447_v29 = vpop.f32.mrf.mxu0 }
 0x106   :  { %v232_v30 = vadd.f32 %v447_v29, %v371_v28 }
 0x107   :  { %v226_v31 = vpop.f32.mrf.mxu0 }
 0x108   :  { %v227_v32 = vadd.f32 %v371_v28, %v226_v31  ;;  %v246_v35 = vmax.f32 %v232_v30, 0.0 }
 0x109   :  { %v450_v33 = vpop.f32.mrf.mxu0 }
 0x10a   :  { %v245_v34 = vmax.f32 %v227_v32, 0.0  ;;  %v242_v36 = vadd.f32 %v450_v33, %v371_v28 }
 0x10b   :  { %v236_v37 = vpop.f32.mrf.mxu0 }
 0x10c   :  { %v237_v38 = vadd.f32 %v371_v28, %v236_v37  ;;  %483 = vmatprep.mubr.f32.mxu1 %v245_v34  ;;  %v248_v40 = vmax.f32 %v242_v36, 0.0 }
 0x10d   :  { %484 = vmatmul.mubr.f32.vlgmr.msra.gmra.mxu1 %v246_v35 }
 0x10e   :  { %v247_v39 = vmax.f32 %v237_v38, 0.0 }
 0x110   :  { %486 = vmatprep.mubr.f32.mxu1 %v247_v39 }
 0x111   :  { %487 = vmatmul.mubr.f32.gmra.mxu1 %v248_v40 }
 0x1cd   :  { %v485_v42 = vpop.f32.mrf.mxu1 }
 0x1ce   :  { %v344_v43 = vadd.f32 %v485_v42, %v372_v41 }
 0x1cf   :  { %v338_v44 = vpop.f32.mrf.mxu1 }
 0x1d0   :  { %359 = vst.msk [vmem:[%s643_s5 + $0x8] sm:$0xff] %vm357_vm0, %v344_v43  ;;  %v339_v45 = vadd.f32 %v372_v41, %v338_v44 }
 0x1d1   :  { %v488_v46 = vpop.f32.mrf.mxu1 }
 0x1d2   :  { %358 = vst.msk [vmem:[%s643_s5] sm:$0xff] %vm357_vm0, %v339_v45  ;;  %v354_v47 = vadd.f32 %v488_v46, %v372_v41 }
 0x1d3   :  { %v348_v48 = vpop.f32.mrf.mxu1 }
 0x1d4   :  { %361 = vst.msk [vmem:[%s643_s5 + $0x18] sm:$0xff] %vm357_vm0, %v354_v47  ;;  %v349_v49 = vadd.f32 %v372_v41, %v348_v48 }
 0x1d6   :  { %360 = vst.msk [vmem:[%s643_s5 + $0x10] sm:$0xff] %vm357_vm0, %v349_v49 }
 0x1d7   :  { %366 = vsyncpa [#allocation3], 1 }
 0x1d8   :  { %367 = vsyncpa [#allocation5], 1 }

</bundles_post_ra>
